<compile_context>
chip_gen: v5e
topology: v5e:2x2
jax: 0.10.0
libtpu: 0.0.40
codegen_flags: <defaults>
</compile_context>

<pallas_src>
import functools
import math

import jax
import jax.numpy as jnp
from jax.experimental import pallas as pl
from jax.experimental.pallas import tpu as pltpu


_VMEM_LIMIT = 48 * 1024 * 1024   # v7x has 64 MiB / TensorCore; leave headroom.

_CP_PAR = pltpu.CompilerParams(
    dimension_semantics=("parallel", "parallel"), vmem_limit_bytes=_VMEM_LIMIT)
_CP_ACC = pltpu.CompilerParams(
    dimension_semantics=("parallel", "arbitrary"), vmem_limit_bytes=_VMEM_LIMIT)


def _ru(x, m):
    return (x + m - 1) // m * m


def _pick_tn(n):
    """Lane tile for a channel dim: as wide as possible, 128-aligned when tiled."""
    if n % 128 == 0:
        if n <= 1024:
            return n
        for t in (512, 384, 256, 128):
            if n % t == 0:
                return t
    return n            # full-dim block (allowed even when not 128-aligned)


def _pick_thw(hw):
    for t in (2048, 1024, 512, 256):
        if hw > t and hw % t == 0:
            return t
    return hw


def _leaky(x):
    return jnp.where(x >= 0, x, 0.2 * x)


# ----------------------------------------------------------------------------
# Pallas kernels
# ----------------------------------------------------------------------------
def _mm_kernel(a_ref, b_ref, bias_ref, o_ref, *, activation):
    """Single-step bf16 x bf16 -> f32 matmul + bias (+ LeakyReLU), bf16 out."""
    r = jnp.dot(a_ref[...], b_ref[...], preferred_element_type=jnp.float32)
    r = r + bias_ref[...]
    if activation == "leaky":
        r = jnp.where(r >= 0, r, 0.2 * r)
    o_ref[...] = r.astype(o_ref.dtype)


def _mm2_kernel(a1_ref, b1_ref, a2_ref, b2_ref, bias_ref, o_ref, *, activation):
    """Concat-free dual matmul: (a1 @ b1 + a2 @ b2) + bias, accumulated in-block."""
    r = jnp.dot(a1_ref[...], b1_ref[...], preferred_element_type=jnp.float32)
    r = r + jnp.dot(a2_ref[...], b2_ref[...], preferred_element_type=jnp.float32)
    r = r + bias_ref[...]
    if activation == "leaky":
        r = jnp.where(r >= 0, r, 0.2 * r)
    o_ref[...] = r.astype(o_ref.dtype)


def _conv_tap_kernel(*refs, k, oh, ow, cin, activation, has_res):
    """Fused stride-1 k x k conv on one padded NHWC sample, all taps in-kernel.

    x_ref: (1, Hp, Wp, Cin) bf16;  w_ref: (k*k*Cin, tn) bf16 (tap-major rows);
    bias_ref: (1, tn) f32;  optional res_ref: (1, oh, ow, tn) bf16 added AFTER
    the activation (matches `x_skip + LeakyReLU(conv3(...))`).
    """
    if has_res:
        x_ref, w_ref, bias_ref, res_ref, o_ref = refs
    else:
        x_ref, w_ref, bias_ref, o_ref = refs
    x = x_ref[0]                                       # (Hp, Wp, Cin)
    cout = o_ref.shape[-1]
    acc = jnp.zeros((oh * ow, cout), jnp.float32)
    for ty in range(k):
        for tx in range(k):
            win = x[ty:ty + oh, tx:tx + ow, :].reshape(oh * ow, cin)
            w_t = w_ref[(ty * k + tx) * cin:(ty * k + tx + 1) * cin, :]
            acc = acc + jnp.dot(win, w_t, preferred_element_type=jnp.float32)
    r = acc + bias_ref[...]
    if activation == "leaky":
        r = jnp.where(r >= 0, r, 0.2 * r)
    if has_res:
        r = r + res_ref[0].reshape(oh * ow, cout).astype(jnp.float32)
    o_ref[0] = r.reshape(oh, ow, cout).astype(o_ref.dtype)


def _gn_stats_kernel(x_ref, s_ref, ss_ref):
    """Pass 1: per-channel sum / sum-of-squares, accumulated across HW tiles."""
    t = pl.program_id(1)

    @pl.when(t == 0)
    def _():
        s_ref[...] = jnp.zeros_like(s_ref)
        ss_ref[...] = jnp.zeros_like(ss_ref)

    x = x_ref[0].astype(jnp.float32)                   # (thw, C)
    s_ref[...] += jnp.sum(x, axis=0, keepdims=True)[None]
    ss_ref[...] += jnp.sum(x * x, axis=0, keepdims=True)[None]


def _gn_apply_kernel(x_ref, mean_ref, rstd_ref, gamma_ref, beta_ref, o_ref):
    """Pass 2: normalize + affine + LeakyReLU(0.2), bf16 in / bf16 out."""
    x = x_ref[0].astype(jnp.float32)
    y = (x - mean_ref[0]) * rstd_ref[0] * gamma_ref[...] + beta_ref[...]
    o_ref[0] = jnp.where(y >= 0, y, 0.2 * y).astype(o_ref.dtype)


# ----------------------------------------------------------------------------
# Pallas wrappers
# ----------------------------------------------------------------------------
def matmul_bias_act(a, wm, bias, activation=None, a2=None, wm2=None,
                    out_dtype=jnp.bfloat16):
    """1x1-conv matmul (single K step, K <= 1024 in this net), optional 2nd input."""
    M = a.shape[0]
    K, N = wm.shape
    a = a.astype(jnp.bfloat16)
    if a.shape[1] < K:                       # prep-time padded K (Cin < 8 case)
        a = jnp.pad(a, ((0, 0), (0, K - a.shape[1])))
    if a2 is not None:
        a2 = a2.astype(jnp.bfloat16)
        K2 = wm2.shape[0]
        if a2.shape[1] < K2:
            a2 = jnp.pad(a2, ((0, 0), (0, K2 - a2.shape[1])))

    tm = M if M <= 256 else 256
    tn = _pick_tn(N)
    # v7x megacore: keep >= 2 blocks on a parallel axis when the grid collapses.
    if M // tm == 1 and N // tn == 1 and tm % 32 == 0:
        tm //= 2
    mp = _ru(M, tm)
    if mp != M:
        a = jnp.pad(a, ((0, mp - M), (0, 0)))
        if a2 is not None:
            a2 = jnp.pad(a2, ((0, mp - M), (0, 0)))

    grid = (mp // tm, N // tn)
    if a2 is None:
        kern = functools.partial(_mm_kernel, activation=activation)
        in_specs = [pl.BlockSpec((tm, K), lambda i, j: (i, 0)),
                    pl.BlockSpec((K, tn), lambda i, j: (0, j)),
                    pl.BlockSpec((1, tn), lambda i, j: (0, j))]
        args = (a, wm, bias)
    else:
        kern = functools.partial(_mm2_kernel, activation=activation)
        in_specs = [pl.BlockSpec((tm, K), lambda i, j: (i, 0)),
                    pl.BlockSpec((K, tn), lambda i, j: (0, j)),
                    pl.BlockSpec((tm, K2), lambda i, j: (i, 0)),
                    pl.BlockSpec((K2, tn), lambda i, j: (0, j)),
                    pl.BlockSpec((1, tn), lambda i, j: (0, j))]
        args = (a, wm, a2, wm2, bias)

    out = pl.pallas_call(
        kern,
        out_shape=jax.ShapeDtypeStruct((mp, N), out_dtype),
        grid=grid,
        in_specs=in_specs,
        out_specs=pl.BlockSpec((tm, tn), lambda i, j: (i, j)),
        compiler_params=_CP_PAR,
    )(*args)
    return out[:M] if mp != M else out


def conv_spatial(x, wm, bias, k, pad, activation=None, residual=None,
                 out_dtype=jnp.bfloat16):
    """Fused stride-1 k x k conv over NHWC (one padded sample per grid step)."""
    nb, h, w, cin = x.shape
    cout = wm.shape[1]
    x = x.astype(jnp.bfloat16)
    if pad:
        x = jnp.pad(x, ((0, 0), (pad, pad), (pad, pad), (0, 0)))
    hp, wp = h + 2 * pad, w + 2 * pad
    oh, ow = hp - k + 1, wp - k + 1
    tn = _pick_tn(cout)

    kern = functools.partial(_conv_tap_kernel, k=k, oh=oh, ow=ow, cin=cin,
                             activation=activation, has_res=residual is not None)
    in_specs = [pl.BlockSpec((1, hp, wp, cin), lambda b, j: (b, 0, 0, 0)),
                pl.BlockSpec((k * k * cin, tn), lambda b, j: (0, j)),
                pl.BlockSpec((1, tn), lambda b, j: (0, j))]
    args = [x, wm, bias]
    if residual is not None:
        in_specs.append(pl.BlockSpec((1, oh, ow, tn), lambda b, j: (b, 0, 0, j)))
        args.append(residual.astype(jnp.bfloat16))

    return pl.pallas_call(
        kern,
        out_shape=jax.ShapeDtypeStruct((nb, oh, ow, cout), out_dtype),
        grid=(nb, cout // tn),
        in_specs=in_specs,
        out_specs=pl.BlockSpec((1, oh, ow, tn), lambda b, j: (b, 0, 0, j)),
        compiler_params=_CP_PAR,
    )(*args)


def conv1x1(x, p, activation=None):
    nb, h, w, c = x.shape
    y = matmul_bias_act(x.reshape(nb * h * w, c), p["wm"], p["b"], activation)
    return y.reshape(nb, h, w, -1)


def conv1x1_dual(x1, x2, p, activation=None):
    """(x1 @ W1 + x2 @ W2) + b -- replaces torch.cat([x1, x2], 1) + 1x1 conv."""
    nb, h, w, c1 = x1.shape
    y = matmul_bias_act(x1.reshape(nb * h * w, c1), p["wm1"], p["b"], activation,
                        a2=x2.reshape(nb * h * w, -1), wm2=p["wm2"])
    return y.reshape(nb, h, w, -1)


def conv_down4x4(x, p, out_dtype=jnp.bfloat16):
    """Conv2d(C, C, k=4, s=2, p=1) == space-to-depth(2) + fused 2x2 stride-1 conv."""
    nb, h, w, c = x.shape
    xp = jnp.pad(x.astype(jnp.bfloat16), ((0, 0), (1, 1), (1, 1), (0, 0)))
    h2, w2 = (h + 2) // 2, (w + 2) // 2
    z = xp.reshape(nb, h2, 2, w2, 2, c).transpose(0, 1, 3, 2, 4, 5)
    z = z.reshape(nb, h2, w2, 4 * c)
    return conv_spatial(z, p["wm"], p["b"], k=2, pad=0, activation=None,
                        out_dtype=out_dtype)


def conv_transpose4x4(x, p, out_dtype=jnp.bfloat16):
    """ConvTranspose2d(k=4, s=2, p=1): one fused 3x3 conv producing the four
    sub-pixel parity groups as channel blocks, then depth-to-space interleave."""
    nb, h, w, c = x.shape
    y = conv_spatial(x, p["wm"], p["b"], k=3, pad=1, activation=None,
                     out_dtype=out_dtype)
    cout = y.shape[-1] // 4
    y = y.reshape(nb, h, w, 2, 2, cout).transpose(0, 1, 3, 2, 4, 5)
    return y.reshape(nb, 2 * h, 2 * w, cout)


def group_norm_lrelu(x, gamma, beta, num_groups=32, eps=1e-5):
    """GroupNorm(num_groups, C) + LeakyReLU(0.2) on NHWC bf16, HW-tiled two-pass."""
    nb, h, w, c = x.shape
    hw = h * w
    cg = c // num_groups
    xr = x.reshape(nb, hw, c).astype(jnp.bfloat16)
    thw = _pick_thw(hw)

    s, ss = pl.pallas_call(
        _gn_stats_kernel,
        out_shape=(jax.ShapeDtypeStruct((nb, 1, c), jnp.float32),
                   jax.ShapeDtypeStruct((nb, 1, c), jnp.float32)),
        grid=(nb, hw // thw),
        in_specs=[pl.BlockSpec((1, thw, c), lambda n, t: (n, t, 0))],
        out_specs=[pl.BlockSpec((1, 1, c), lambda n, t: (n, 0, 0)),
                   pl.BlockSpec((1, 1, c), lambda n, t: (n, 0, 0))],
        compiler_params=_CP_ACC,
    )(xr)

    # Tiny per-(sample, group) stat combine stays in XLA (a few KiB).
    sg = s[:, 0, :].reshape(nb, num_groups, cg).sum(-1)
    ssg = ss[:, 0, :].reshape(nb, num_groups, cg).sum(-1)
    cnt = float(hw * cg)
    mean_g = sg / cnt
    var_g = ssg / cnt - mean_g * mean_g
    rstd_g = jax.lax.rsqrt(var_g + eps)
    mean_c = jnp.repeat(mean_g, cg, axis=-1).reshape(nb, 1, c)
    rstd_c = jnp.repeat(rstd_g, cg, axis=-1).reshape(nb, 1, c)

    y = pl.pallas_call(
        _gn_apply_kernel,
        out_shape=jax.ShapeDtypeStruct((nb, hw, c), jnp.bfloat16),
        grid=(nb, hw // thw),
        in_specs=[pl.BlockSpec((1, thw, c), lambda n, t: (n, t, 0)),
                  pl.BlockSpec((1, 1, c), lambda n, t: (n, 0, 0)),
                  pl.BlockSpec((1, 1, c), lambda n, t: (n, 0, 0)),
                  pl.BlockSpec((1, c), lambda n, t: (0, 0)),
                  pl.BlockSpec((1, c), lambda n, t: (0, 0))],
        out_specs=pl.BlockSpec((1, thw, c), lambda n, t: (n, t, 0)),
        compiler_params=_CP_PAR,
    )(xr, mean_c, rstd_c,
      gamma.reshape(1, c).astype(jnp.float32),
      beta.reshape(1, c).astype(jnp.float32))
    return y.reshape(nb, h, w, c)


# ----------------------------------------------------------------------------
# Model blocks (ResConvBlock variant, matching Generator(CB='ResConvBlock'))
# ----------------------------------------------------------------------------
def res_conv_block_down(p, x):
    """ResConvBlock, Res_bool=True: residual add fused into conv3's epilogue."""
    h = conv1x1(x, p["conv1"], activation="leaky")
    h = conv1x1(h, p["conv2"], activation="leaky")
    cout = p["conv3"]["wm"].shape[1]
    skip = conv1x1(x, p["skip"], activation=None) if x.shape[-1] != cout else x
    return conv_spatial(h, p["conv3"]["wm"], p["conv3"]["b"], k=3, pad=1,
                        activation="leaky", residual=skip)


def res_conv_block_up(p, x1, x2):
    """ResConvBlock, Res_bool=False, on torch.cat([x1, x2], 1) (concat-free)."""
    h = conv1x1_dual(x1, x2, p["conv1"], activation="leaky")
    h = conv1x1(h, p["conv2"], activation="leaky")
    return conv_spatial(h, p["conv3"]["wm"], p["conv3"]["b"], k=3, pad=1,
                        activation="leaky")


def down_block(p, x):
    x = res_conv_block_down(p["rcb"], x)
    xd = conv_down4x4(x, p["d_conv"])
    xd = group_norm_lrelu(xd, p["gn_gamma"], p["gn_beta"])
    return x, xd


def down_conv_block(p, x):
    x = conv_spatial(x, p["conv"]["wm"], p["conv"]["b"], k=3, pad=1,
                     activation=None)
    return group_norm_lrelu(x, p["gn_gamma"], p["gn_beta"])


def up_block(p, x, x_skip):
    xu = conv_transpose4x4(x, p["u_convt"])
    xu = group_norm_lrelu(xu, p["gn_gamma"], p["gn_beta"])
    return res_conv_block_up(p["rcb"], xu, x_skip)


def generator_forward(params, x):
    """x: (N, 1, H, W) NCHW (PyTorch convention) -> (N, 1, H, W) f32."""
    x = jnp.transpose(x, (0, 2, 3, 1)).astype(jnp.float32)   # NCHW -> NHWC
    s1_skip, x = down_block(params["s1_down"], x)
    s2_skip, x = down_block(params["s2_down"], x)
    s3_skip, x = down_block(params["s3_down"], x)
    s4_skip, x = down_block(params["s4_down"], x)
    x = down_conv_block(params["down"], x)
    x = up_block(params["s4_up"], x, s4_skip)
    x = up_block(params["s3_up"], x, s3_skip)
    x = up_block(params["s2_up"], x, s2_skip)
    x = up_block(params["s1_up"], x, s1_skip)
    out = conv_spatial(x, params["output"]["wm"], params["output"]["b"],
                       k=3, pad=1, activation=None, out_dtype=jnp.float32)
    return jnp.transpose(out, (0, 3, 1, 2))                  # NHWC -> NCHW


# ----------------------------------------------------------------------------
# Parameter init (PyTorch layout) + one-time matmul-layout / bf16 preparation
# ----------------------------------------------------------------------------
def _conv_params(key, cin, cout, k):
    k1, k2 = jax.random.split(key)
    scale = 1.0 / math.sqrt(cin * k * k)
    w = jax.random.uniform(k1, (cout, cin, k, k), jnp.float32, -scale, scale)
    b = jax.random.uniform(k2, (cout,), jnp.float32, -scale, scale)
    return {"w": w, "b": b}


def _convt_params(key, cin, cout, k):
    k1, k2 = jax.random.split(key)
    scale = 1.0 / math.sqrt(cin * k * k)
    w = jax.random.uniform(k1, (cin, cout, k, k), jnp.float32, -scale, scale)
    b = jax.random.uniform(k2, (cout,), jnp.float32, -scale, scale)
    return {"w": w, "b": b}


def init_generator_params(key):
    keys = iter(jax.random.split(key, 64))

    def rcb(cout, cm, cin):
        return {"conv1": _conv_params(next(keys), cin, cm, 1),
                "conv2": _conv_params(next(keys), cm, cm, 1),
                "conv3": _conv_params(next(keys), cm, cout, 3),
                "skip": _conv_params(next(keys), cin, cout, 1)}

    def down_p(cin, cm, cout):
        return {"rcb": rcb(cout, cm, cin),
                "d_conv": _conv_params(next(keys), cout, cout, 4),
                "gn_gamma": jnp.ones((cout,), jnp.float32),
                "gn_beta": jnp.zeros((cout,), jnp.float32)}

    def up_p(cin, cm, cout):
        return {"u_convt": _convt_params(next(keys), cin, cin, 4),
                "gn_gamma": jnp.ones((cin,), jnp.float32),
                "gn_beta": jnp.zeros((cin,), jnp.float32),
                "rcb": rcb(cout, cm, 2 * cin)}

    return {
        "s1_down": down_p(1, 32, 64),
        "s2_down": down_p(64, 96, 128),
        "s3_down": down_p(128, 192, 256),
        "s4_down": down_p(256, 384, 512),
        "down": {"conv": _conv_params(next(keys), 512, 512, 3),
                 "gn_gamma": jnp.ones((512,), jnp.float32),
                 "gn_beta": jnp.zeros((512,), jnp.float32)},
        "s4_up": up_p(512, 640, 256),
        "s3_up": up_p(256, 320, 128),
        "s2_up": up_p(128, 160, 64),
        "s1_up": up_p(64, 80, 32),
        "output": _conv_params(next(keys), 32, 1, 3),
    }


def _prep_conv1x1(p):
    w, b = p["w"], p["b"]                       # (Cout, Cin, 1, 1)
    cout, cin = w.shape[0], w.shape[1]
    wm = jnp.transpose(w.reshape(cout, cin), (1, 0))
    if cin < 8:                                 # keep the contracting dim >= 8
        wm = jnp.pad(wm, ((0, 8 - cin), (0, 0)))
    return {"wm": wm.astype(jnp.bfloat16),
            "b": b.reshape(1, cout).astype(jnp.float32)}


def _prep_conv_kxk(p, k):
    w, b = p["w"], p["b"]                       # (Cout, Cin, k, k)
    cout, cin = w.shape[0], w.shape[1]
    wm = jnp.transpose(w, (2, 3, 1, 0)).reshape(k * k * cin, cout)
    return {"wm": wm.astype(jnp.bfloat16),
            "b": b.reshape(1, cout).astype(jnp.float32)}


def _prep_dconv4x4(p):
    """Conv2d(k=4, s=2, p=1) -> 2x2 stride-1 conv over the space-to-depth input."""
    w, b = p["w"], p["b"]                       # (Cout, Cin, 4, 4)
    cout, cin = w.shape[0], w.shape[1]
    w6 = w.reshape(cout, cin, 2, 2, 2, 2)       # (co, c, a, r, b, s): ky=2a+r, kx=2b+s
    wm = jnp.transpose(w6, (2, 4, 3, 5, 1, 0)).reshape(16 * cin, cout)
    return {"wm": wm.astype(jnp.bfloat16),
            "b": b.reshape(1, cout).astype(jnp.float32)}


def _prep_convt4x4(p):
    """ConvTranspose2d(k=4, s=2, p=1) -> one 3x3 stride-1 conv whose output
    channels hold the four sub-pixel parity groups (ry, rx)."""
    w, b = p["w"], p["b"]                       # (Cin, Cout, 4, 4)
    cin, cout = w.shape[0], w.shape[1]
    sel = {0: ((0, 3), (1, 1)), 1: ((1, 2), (2, 0))}   # parity -> ((tap, k_idx), ..)
    w3 = jnp.zeros((3, 3, cin, 4 * cout), jnp.float32)
    for ry in (0, 1):
        for rx in (0, 1):
            g = ry * 2 + rx
            for ty, ky in sel[ry]:
                for tx, kx in sel[rx]:
                    w3 = w3.at[ty, tx, :, g * cout:(g + 1) * cout].set(w[:, :, ky, kx])
    wm = w3.reshape(9 * cin, 4 * cout)
    b4 = jnp.tile(b.reshape(1, cout), (1, 4))
    return {"wm": wm.astype(jnp.bfloat16), "b": b4.astype(jnp.float32)}


def _prep_rcb(p, dual_in=None):
    out = {"conv2": _prep_conv1x1(p["conv2"]),
           "conv3": _prep_conv_kxk(p["conv3"], 3),
           "skip": _prep_conv1x1(p["skip"])}
    c1 = _prep_conv1x1(p["conv1"])
    if dual_in is None:
        out["conv1"] = c1
    else:                                       # split for the concat-free dual matmul
        out["conv1"] = {"wm1": c1["wm"][:dual_in], "wm2": c1["wm"][dual_in:],
                        "b": c1["b"]}
    return out


def prepare_generator_params(params):
    def prep_down(p):
        return {"rcb": _prep_rcb(p["rcb"]),
                "d_conv": _prep_dconv4x4(p["d_conv"]),
                "gn_gamma": p["gn_gamma"], "gn_beta": p["gn_beta"]}

    def prep_up(p, in_ch):
        return {"u_convt": _prep_convt4x4(p["u_convt"]),
                "gn_gamma": p["gn_gamma"], "gn_beta": p["gn_beta"],
                "rcb": _prep_rcb(p["rcb"], dual_in=in_ch)}

    return {
        "s1_down": prep_down(params["s1_down"]),
        "s2_down": prep_down(params["s2_down"]),
        "s3_down": prep_down(params["s3_down"]),
        "s4_down": prep_down(params["s4_down"]),
        "down": {"conv": _prep_conv_kxk(params["down"]["conv"], 3),
                 "gn_gamma": params["down"]["gn_gamma"],
                 "gn_beta": params["down"]["gn_beta"]},
        "s4_up": prep_up(params["s4_up"], 512),
        "s3_up": prep_up(params["s3_up"], 256),
        "s2_up": prep_up(params["s2_up"], 128),
        "s1_up": prep_up(params["s1_up"], 64),
        "output": _prep_conv_kxk(params["output"], 3),
    }


# ----------------------------------------------------------------------------
# Numerical self-checks (kernel + weight-layout mappings vs XLA references)
# ----------------------------------------------------------------------------
def _ref_conv_nhwc(x, w_oihw, b, stride, pad):
    w = jnp.transpose(w_oihw, (2, 3, 1, 0))            # HWIO
    y = jax.lax.conv_general_dilated(
        x, w, (stride, stride), ((pad, pad), (pad, pad)),
        dimension_numbers=("NHWC", "HWIO", "NHWC"))
    return y + b.reshape(1, 1, 1, -1)


def _ref_convt_nhwc(x, w_iohw, b):
    """PyTorch ConvTranspose2d(k=4, s=2, p=1) via dilated conv with flipped kernel."""
    w = jnp.transpose(jnp.flip(w_iohw, (2, 3)), (2, 3, 0, 1))   # HWIO
    y = jax.lax.conv_general_dilated(
        x, w, (1, 1), ((2, 2), (2, 2)), lhs_dilation=(2, 2),
        dimension_numbers=("NHWC", "HWIO", "NHWC"))
    return y + b.reshape(1, 1, 1, -1)


def _assert_close(got, ref, name, rtol=3e-2):
    got = jnp.asarray(got, jnp.float32)
    ref = jnp.asarray(ref, jnp.float32)
    err = float(jnp.max(jnp.abs(got - ref)))
    scale = float(jnp.max(jnp.abs(ref))) + 1e-6
    assert err <= rtol * scale + 1e-3, f"{name}: max err {err:.4e} vs scale {scale:.4e}"


def _self_test(key):
    kk = jax.random.split(key, 16)
    bf = lambda t: t.astype(jnp.bfloat16).astype(jnp.float32)

    # fused 3x3 conv + LeakyReLU + fused residual add
    w = jax.random.normal(kk[0], (24, 16, 3, 3), jnp.float32) * 0.1
    b = jax.random.normal(kk[1], (24,), jnp.float32) * 0.1
    x = jax.random.normal(kk[2], (2, 8, 8, 16), jnp.float32)
    res = jax.random.normal(kk[3], (2, 8, 8, 24), jnp.float32)
    p = _prep_conv_kxk({"w": w, "b": b}, 3)
    got = conv_spatial(x, p["wm"], p["b"], k=3, pad=1, activation="leaky",
                       residual=res, out_dtype=jnp.float32)
    ref = _leaky(_ref_conv_nhwc(bf(x), bf(w), b, 1, 1)) + bf(res)
    _assert_close(got, ref, "conv3x3+res")

    # Conv2d(4, 4, stride=2, pad=1) via space-to-depth
    w = jax.random.normal(kk[4], (24, 16, 4, 4), jnp.float32) * 0.1
    b = jax.random.normal(kk[5], (24,), jnp.float32) * 0.1
    x = jax.random.normal(kk[6], (2, 8, 8, 16), jnp.float32)
    p = _prep_dconv4x4({"w": w, "b": b})
    got = conv_down4x4(x, p, out_dtype=jnp.float32)
    ref = _ref_conv_nhwc(bf(x), bf(w), b, 2, 1)
    _assert_close(got, ref, "conv4x4s2")

    # ConvTranspose2d(4, 4, stride=2, pad=1) via combined 3x3 conv
    w = jax.random.normal(kk[7], (16, 16, 4, 4), jnp.float32) * 0.1
    b = jax.random.normal(kk[8], (16,), jnp.float32) * 0.1
    x = jax.random.normal(kk[9], (2, 4, 4, 16), jnp.float32)
    p = _prep_convt4x4({"w": w, "b": b})
    got = conv_transpose4x4(x, p, out_dtype=jnp.float32)
    ref = _ref_convt_nhwc(bf(x), bf(w), b)
    _assert_close(got, ref, "convtranspose4x4")

    # GroupNorm(32, 64) + LeakyReLU
    x = jax.random.normal(kk[10], (2, 4, 4, 64), jnp.float32)
    gamma = 1.0 + 0.1 * jax.random.normal(kk[11], (64,), jnp.float32)
    beta = 0.1 * jax.random.normal(kk[12], (64,), jnp.float32)
    got = group_norm_lrelu(x.astype(jnp.bfloat16), gamma, beta)
    xf = bf(x).reshape(2, 16, 32, 2)
    mu = xf.mean(axis=(1, 3), keepdims=True)
    var = ((xf - mu) ** 2).mean(axis=(1, 3), keepdims=True)
    ref = ((xf - mu) * jax.lax.rsqrt(var + 1e-5)).reshape(2, 16, 64)
    ref = _leaky(ref * gamma.reshape(1, 1, 64) + beta.reshape(1, 1, 64))
    _assert_close(got.reshape(2, 16, 64), ref, "groupnorm")

    # concat-free dual 1x1 conv
    w = jax.random.normal(kk[13], (24, 48, 1, 1), jnp.float32) * 0.2
    b = jax.random.normal(kk[14], (24,), jnp.float32) * 0.1
    x1 = jax.random.normal(kk[15], (2, 4, 4, 32), jnp.float32)
    x2 = jax.random.normal(kk[0], (2, 4, 4, 16), jnp.float32)
    c1 = _prep_conv1x1({"w": w, "b": b})
    pd = {"wm1": c1["wm"][:32], "wm2": c1["wm"][32:], "b": c1["b"]}
    got = conv1x1_dual(x1, x2, pd, activation="leaky")
    ref = _leaky(_ref_conv_nhwc(jnp.concatenate([bf(x1), bf(x2)], -1), bf(w), b, 1, 0))
    _assert_close(got, ref, "dual_1x1")


# ----------------------------------------------------------------------------
if __name__ == "__main__":
    key = jax.random.PRNGKey(0)
    pkey, xkey, tkey = jax.random.split(key, 3)

    _self_test(tkey)                               # per-op numerical validation

    params = init_generator_params(pkey)
    prepared = prepare_generator_params(params)    # one-time weight prep (bf16)

    # Architecture-consistent small input: 16 survives four stride-2 downsamples
    # (16 -> 8 -> 4 -> 2 -> 1) and comes back up to 16.
    x = jax.random.normal(xkey, (2, 1, 16, 16), jnp.float32)

    fwd = jax.jit(generator_forward)
    out = jax.block_until_ready(fwd(prepared, x))
    assert out.shape == (2, 1, 16, 16), out.shape
    assert bool(jnp.all(jnp.isfinite(out)))
    print("KERNEL_OK")
</pallas_src>

<mosaic_0001>
module attributes {stable_mosaic.version = 11 : i64} {
  func.func @_conv_tap_kernel(%arg0: i32, %arg1: i32, %arg2: memref<1x10x10x16xbf16, #tpu.memory_space<vmem>>, %arg3: memref<144x24xbf16, #tpu.memory_space<vmem>>, %arg4: memref<1x24xf32, #tpu.memory_space<vmem>>, %arg5: memref<1x8x8x24xbf16, #tpu.memory_space<vmem>>, %arg6: memref<1x8x8x24xf32, #tpu.memory_space<vmem>>) attributes {dimension_semantics = [#tpu.dimension_semantics<parallel>, #tpu.dimension_semantics<parallel>], iteration_bounds = array<i64: 2, 1>, scalar_prefetch = 0 : i64, scratch_operands = 0 : i64, tpu.core_type = #tpu.core_type<tc>, window_params = [{transform_indices = @transform_0, window_bounds = array<i64: 1, 10, 10, 16>}, {transform_indices = @transform_1, window_bounds = array<i64: 144, 24>}, {transform_indices = @transform_2, window_bounds = array<i64: 1, 24>}, {transform_indices = @transform_3, window_bounds = array<i64: 1, 8, 8, 24>}, {transform_indices = @transform_4, window_bounds = array<i64: 1, 8, 8, 24>}]} {
    %c0 = arith.constant 0 : index
    %c0_0 = arith.constant 0 : index
    %c0_1 = arith.constant 0 : index
    %c0_2 = arith.constant 0 : index
    %0 = vector.load %arg2[%c0, %c0_0, %c0_1, %c0_2] : memref<1x10x10x16xbf16, #tpu.memory_space<vmem>>, vector<1x10x10x16xbf16>
    %1 = vector.shape_cast %0 : vector<1x10x10x16xbf16> to vector<10x10x16xbf16>
    %cst = arith.constant 0.000000e+00 : f32
    %2 = vector.broadcast %cst : f32 to vector<64x24xf32>
    %3 = vector.extract_strided_slice %1 {offsets = [0, 0, 0], sizes = [8, 8, 16], strides = [1, 1, 1]} : vector<10x10x16xbf16> to vector<8x8x16xbf16>
    %4 = vector.shape_cast %3 : vector<8x8x16xbf16> to vector<64x16xbf16>
    %c0_3 = arith.constant 0 : index
    %c0_4 = arith.constant 0 : index
    %5 = vector.load %arg3[%c0_3, %c0_4] : memref<144x24xbf16, #tpu.memory_space<vmem>>, vector<16x24xbf16>
    %cst_5 = arith.constant dense<0.000000e+00> : vector<64x24xf32>
    %6 = tpu.matmul %4, %5, %cst_5 {dimension_numbers = #tpu.dot_dimension_numbers<[1], [0], [0], [1], [0, 0, 1, 1], [], []>} : vector<64x16xbf16>, vector<16x24xbf16>, vector<64x24xf32> -> vector<64x24xf32>
    %7 = arith.addf %2, %6 : vector<64x24xf32>
    %8 = vector.extract_strided_slice %1 {offsets = [0, 1, 0], sizes = [8, 8, 16], strides = [1, 1, 1]} : vector<10x10x16xbf16> to vector<8x8x16xbf16>
    %9 = vector.shape_cast %8 : vector<8x8x16xbf16> to vector<64x16xbf16>
    %c16 = arith.constant 16 : index
    %c0_6 = arith.constant 0 : index
    %10 = vector.load %arg3[%c16, %c0_6] : memref<144x24xbf16, #tpu.memory_space<vmem>>, vector<16x24xbf16>
    %cst_7 = arith.constant dense<0.000000e+00> : vector<64x24xf32>
    %11 = tpu.matmul %9, %10, %cst_7 {dimension_numbers = #tpu.dot_dimension_numbers<[1], [0], [0], [1], [0, 0, 1, 1], [], []>} : vector<64x16xbf16>, vector<16x24xbf16>, vector<64x24xf32> -> vector<64x24xf32>
    %12 = arith.addf %7, %11 : vector<64x24xf32>
    %13 = vector.extract_strided_slice %1 {offsets = [0, 2, 0], sizes = [8, 8, 16], strides = [1, 1, 1]} : vector<10x10x16xbf16> to vector<8x8x16xbf16>
    %14 = vector.shape_cast %13 : vector<8x8x16xbf16> to vector<64x16xbf16>
    %c32 = arith.constant 32 : index
    %c0_8 = arith.constant 0 : index
    %15 = vector.load %arg3[%c32, %c0_8] : memref<144x24xbf16, #tpu.memory_space<vmem>>, vector<16x24xbf16>
    %cst_9 = arith.constant dense<0.000000e+00> : vector<64x24xf32>
    %16 = tpu.matmul %14, %15, %cst_9 {dimension_numbers = #tpu.dot_dimension_numbers<[1], [0], [0], [1], [0, 0, 1, 1], [], []>} : vector<64x16xbf16>, vector<16x24xbf16>, vector<64x24xf32> -> vector<64x24xf32>
    %17 = arith.addf %12, %16 : vector<64x24xf32>
    %18 = vector.extract_strided_slice %1 {offsets = [1, 0, 0], sizes = [8, 8, 16], strides = [1, 1, 1]} : vector<10x10x16xbf16> to vector<8x8x16xbf16>
    %19 = vector.shape_cast %18 : vector<8x8x16xbf16> to vector<64x16xbf16>
    %c48 = arith.constant 48 : index
    %c0_10 = arith.constant 0 : index
    %20 = vector.load %arg3[%c48, %c0_10] : memref<144x24xbf16, #tpu.memory_space<vmem>>, vector<16x24xbf16>
    %cst_11 = arith.constant dense<0.000000e+00> : vector<64x24xf32>
    %21 = tpu.matmul %19, %20, %cst_11 {dimension_numbers = #tpu.dot_dimension_numbers<[1], [0], [0], [1], [0, 0, 1, 1], [], []>} : vector<64x16xbf16>, vector<16x24xbf16>, vector<64x24xf32> -> vector<64x24xf32>
    %22 = arith.addf %17, %21 : vector<64x24xf32>
    %23 = vector.extract_strided_slice %1 {offsets = [1, 1, 0], sizes = [8, 8, 16], strides = [1, 1, 1]} : vector<10x10x16xbf16> to vector<8x8x16xbf16>
    %24 = vector.shape_cast %23 : vector<8x8x16xbf16> to vector<64x16xbf16>
    %c64 = arith.constant 64 : index
    %c0_12 = arith.constant 0 : index
    %25 = vector.load %arg3[%c64, %c0_12] : memref<144x24xbf16, #tpu.memory_space<vmem>>, vector<16x24xbf16>
    %cst_13 = arith.constant dense<0.000000e+00> : vector<64x24xf32>
    %26 = tpu.matmul %24, %25, %cst_13 {dimension_numbers = #tpu.dot_dimension_numbers<[1], [0], [0], [1], [0, 0, 1, 1], [], []>} : vector<64x16xbf16>, vector<16x24xbf16>, vector<64x24xf32> -> vector<64x24xf32>
    %27 = arith.addf %22, %26 : vector<64x24xf32>
    %28 = vector.extract_strided_slice %1 {offsets = [1, 2, 0], sizes = [8, 8, 16], strides = [1, 1, 1]} : vector<10x10x16xbf16> to vector<8x8x16xbf16>
    %29 = vector.shape_cast %28 : vector<8x8x16xbf16> to vector<64x16xbf16>
    %c80 = arith.constant 80 : index
    %c0_14 = arith.constant 0 : index
    %30 = vector.load %arg3[%c80, %c0_14] : memref<144x24xbf16, #tpu.memory_space<vmem>>, vector<16x24xbf16>
    %cst_15 = arith.constant dense<0.000000e+00> : vector<64x24xf32>
    %31 = tpu.matmul %29, %30, %cst_15 {dimension_numbers = #tpu.dot_dimension_numbers<[1], [0], [0], [1], [0, 0, 1, 1], [], []>} : vector<64x16xbf16>, vector<16x24xbf16>, vector<64x24xf32> -> vector<64x24xf32>
    %32 = arith.addf %27, %31 : vector<64x24xf32>
    %33 = vector.extract_strided_slice %1 {offsets = [2, 0, 0], sizes = [8, 8, 16], strides = [1, 1, 1]} : vector<10x10x16xbf16> to vector<8x8x16xbf16>
    %34 = vector.shape_cast %33 : vector<8x8x16xbf16> to vector<64x16xbf16>
    %c96 = arith.constant 96 : index
    %c0_16 = arith.constant 0 : index
    %35 = vector.load %arg3[%c96, %c0_16] : memref<144x24xbf16, #tpu.memory_space<vmem>>, vector<16x24xbf16>
    %cst_17 = arith.constant dense<0.000000e+00> : vector<64x24xf32>
    %36 = tpu.matmul %34, %35, %cst_17 {dimension_numbers = #tpu.dot_dimension_numbers<[1], [0], [0], [1], [0, 0, 1, 1], [], []>} : vector<64x16xbf16>, vector<16x24xbf16>, vector<64x24xf32> -> vector<64x24xf32>
    %37 = arith.addf %32, %36 : vector<64x24xf32>
    %38 = vector.extract_strided_slice %1 {offsets = [2, 1, 0], sizes = [8, 8, 16], strides = [1, 1, 1]} : vector<10x10x16xbf16> to vector<8x8x16xbf16>
    %39 = vector.shape_cast %38 : vector<8x8x16xbf16> to vector<64x16xbf16>
    %c112 = arith.constant 112 : index
    %c0_18 = arith.constant 0 : index
    %40 = vector.load %arg3[%c112, %c0_18] : memref<144x24xbf16, #tpu.memory_space<vmem>>, vector<16x24xbf16>
    %cst_19 = arith.constant dense<0.000000e+00> : vector<64x24xf32>
    %41 = tpu.matmul %39, %40, %cst_19 {dimension_numbers = #tpu.dot_dimension_numbers<[1], [0], [0], [1], [0, 0, 1, 1], [], []>} : vector<64x16xbf16>, vector<16x24xbf16>, vector<64x24xf32> -> vector<64x24xf32>
    %42 = arith.addf %37, %41 : vector<64x24xf32>
    %43 = vector.extract_strided_slice %1 {offsets = [2, 2, 0], sizes = [8, 8, 16], strides = [1, 1, 1]} : vector<10x10x16xbf16> to vector<8x8x16xbf16>
    %44 = vector.shape_cast %43 : vector<8x8x16xbf16> to vector<64x16xbf16>
    %c128 = arith.constant 128 : index
    %c0_20 = arith.constant 0 : index
    %45 = vector.load %arg3[%c128, %c0_20] : memref<144x24xbf16, #tpu.memory_space<vmem>>, vector<16x24xbf16>
    %cst_21 = arith.constant dense<0.000000e+00> : vector<64x24xf32>
    %46 = tpu.matmul %44, %45, %cst_21 {dimension_numbers = #tpu.dot_dimension_numbers<[1], [0], [0], [1], [0, 0, 1, 1], [], []>} : vector<64x16xbf16>, vector<16x24xbf16>, vector<64x24xf32> -> vector<64x24xf32>
    %47 = arith.addf %42, %46 : vector<64x24xf32>
    %c0_22 = arith.constant 0 : index
    %c0_23 = arith.constant 0 : index
    %48 = vector.load %arg4[%c0_22, %c0_23] : memref<1x24xf32, #tpu.memory_space<vmem>>, vector<1x24xf32>
    %49 = vector.broadcast %48 : vector<1x24xf32> to vector<64x24xf32>
    %50 = arith.addf %47, %49 : vector<64x24xf32>
    %cst_24 = arith.constant 0.000000e+00 : f32
    %51 = vector.broadcast %cst_24 : f32 to vector<64x24xf32>
    %52 = arith.cmpf oge, %50, %51 : vector<64x24xf32>
    %cst_25 = arith.constant 2.000000e-01 : f32
    %53 = vector.broadcast %cst_25 : f32 to vector<64x24xf32>
    %54 = arith.mulf %53, %50 : vector<64x24xf32>
    %55 = arith.select %52, %50, %54 : vector<64x24xi1>, vector<64x24xf32>
    %c0_26 = arith.constant 0 : index
    %c0_27 = arith.constant 0 : index
    %c0_28 = arith.constant 0 : index
    %c0_29 = arith.constant 0 : index
    %56 = vector.load %arg5[%c0_26, %c0_27, %c0_28, %c0_29] : memref<1x8x8x24xbf16, #tpu.memory_space<vmem>>, vector<1x8x8x24xbf16>
    %57 = vector.shape_cast %56 : vector<1x8x8x24xbf16> to vector<8x8x24xbf16>
    %58 = vector.shape_cast %57 : vector<8x8x24xbf16> to vector<64x24xbf16>
    %59 = arith.extf %58 : vector<64x24xbf16> to vector<64x24xf32>
    %60 = arith.addf %55, %59 : vector<64x24xf32>
    %61 = vector.shape_cast %60 : vector<64x24xf32> to vector<8x8x24xf32>
    %c0_30 = arith.constant 0 : index
    %c0_31 = arith.constant 0 : index
    %c0_32 = arith.constant 0 : index
    %c0_33 = arith.constant 0 : index
    %62 = vector.load %arg6[%c0_30, %c0_31, %c0_32, %c0_33] : memref<1x8x8x24xf32, #tpu.memory_space<vmem>>, vector<1x8x8x24xf32>
    %63 = vector.shape_cast %62 : vector<1x8x8x24xf32> to vector<8x8x24xf32>
    %64 = vector.shape_cast %61 : vector<8x8x24xf32> to vector<1x8x8x24xf32>
    tpu.vector_store %arg6[%c0_30, %c0_31, %c0_32, %c0_33], %64 {strides = array<i32>} : memref<1x8x8x24xf32, #tpu.memory_space<vmem>>, vector<1x8x8x24xf32>,
    return
  }
  func.func @transform_0(%arg0: i32, %arg1: i32) -> (i32, i32, i32, i32) {
    %c0_i32 = arith.constant 0 : i32
    %c0_i32_0 = arith.constant 0 : i32
    %c0_i32_1 = arith.constant 0 : i32
    %c0_i32_2 = arith.constant 0 : i32
    return %arg0, %c0_i32, %c0_i32_0, %c0_i32_1 : i32, i32, i32, i32
  }
  func.func @transform_1(%arg0: i32, %arg1: i32) -> (i32, i32) {
    %c0_i32 = arith.constant 0 : i32
    %c0_i32_0 = arith.constant 0 : i32
    return %c0_i32, %arg1 : i32, i32
  }
  func.func @transform_2(%arg0: i32, %arg1: i32) -> (i32, i32) {
    %c0_i32 = arith.constant 0 : i32
    %c0_i32_0 = arith.constant 0 : i32
    return %c0_i32, %arg1 : i32, i32
  }
  func.func @transform_3(%arg0: i32, %arg1: i32) -> (i32, i32, i32, i32) {
    %c0_i32 = arith.constant 0 : i32
    %c0_i32_0 = arith.constant 0 : i32
    %c0_i32_1 = arith.constant 0 : i32
    return %arg0, %c0_i32, %c0_i32_0, %arg1 : i32, i32, i32, i32
  }
  func.func @transform_4(%arg0: i32, %arg1: i32) -> (i32, i32, i32, i32) {
    %c0_i32 = arith.constant 0 : i32
    %c0_i32_0 = arith.constant 0 : i32
    %c0_i32_1 = arith.constant 0 : i32
    return %arg0, %c0_i32, %c0_i32_0, %arg1 : i32, i32, i32, i32
  }
}

</mosaic_0001>

<bundles_post_ra>
// kernel: tpu_custom_call.1
= control target key start
LH: loop header
LB: loop body
LE: loop exit
PB: predicated region body
PF: predicated region fallthrough
CT: control target
= control target key end

     0   :  { %9 = vsyncpa [#allocation3], 0  ;;  %s2015_s0 = inlined_call_operand.vmem [shape: bf16[2,10,10,16], index: 0, kind: input, shape index: {}]   ;;  %s2016_s1 = inlined_call_operand.vmem [shape: bf16[144,24], index: 1, kind: input, shape index: {}]   ;;  %s2017_s2 = inlined_call_operand.vmem [shape: f32[1,24], index: 2, kind: input, shape index: {}]   ;;  %s2018_s3 = inlined_call_operand.vmem [shape: bf16[2,8,8,24], index: 3, kind: input, shape index: {}]   ;;  %s2019_s4 = inlined_call_operand.hbm [shape: f32[2,8,8,24], index: 4, kind: output, shape index: {}]  }
   0x1   :  { %11 = vsyncpa [#allocation3 + $0x1], 0  ;;  %s1527_s15 = smov 0   ;;  %s1529_s16 = smov 0  }
   0x2   :  { %s1531_s17 = smov 0   ;;  %s1533_s18 = smov 0  }
   0x3   :  { %s1535_s19 = smov 0   ;;  %s1537_s20 = smov 0  }
   0x4 LB: > { %s1230_s21 = sadd.s32 4294967295, %s1498_s20   ;;  %s1231_s22 = sadd.s32 4294967294, %s1498_s20   ;;  %s1498_s20 = sphi %s1537_s20, %s17_s20   ;;  %s1494_s19 = sphi %s1535_s19, %s2030_s19   ;;  %s1490_s18 = sphi %s1533_s18, %s2029_s18   ;;  %s1486_s17 = sphi %s1531_s17, %s2028_s17   ;;  %s1482_s16 = sphi %s1529_s16, %s2027_s16   ;;  %s1478_s15 = sphi %s1527_s15, %s2026_s15  }
   0x5   : > { %s29_s23 = sadd.s32 1, %s1494_s19  ;;  %s144_s24 = sadd.s32 1, %s1486_s17 }
   0x6   : > { %p31_p0 = scmp.ge.s32.totalorder %s29_s23, 2  ;;  %p154_p1 = scmp.ne.s32.totalorder %s1486_s17, %s1482_s16 }
   0x7   : > { %p155_p2 = scmp.eq.s32.totalorder %s1230_s21, 1  ;;  %p160_p3 = scmp.ne.s32.totalorder %s1482_s16, %s1478_s15 }
   0x8   : > { %s2032_s23 = smov (%p31_p0, %s29_s23), 0  ;;  %p161_p5 = scmp.eq.s32.totalorder %s1231_s22, 1 }
   0x9   : > { %p1567_p4 = por %p155_p2, %p154_p1  ;;  %s139_s26 = ssub.s32 %s1494_s19, %s2032_s23 }
   0xa   : > { %p1236_p6 = scmp.ge.s32.totalorder %s1498_s20, 1  ;;  %p142_p7 = scmp.eq.s32.totalorder %s139_s26, 0 }
   0xb   : > { %p1574_p8 = por %p161_p5, %p160_p3  ;;  %p211_p9 = scmp.lt.s32.totalorder %s1498_s20, 3 }
   0xc   : > { %s1580_s28 = scalar_select %p142_p7, %s1486_s17, %s144_s24  }
   0xd   : > { %p212_p10 = pnand %p1236_p6, %p211_p9 }
   0xe   : > { %p252_p11 = scmp.lt.s32.totalorder (!%p212_p10), %s1490_s18, 1  ;;  %s1338_s29 = sshll.u32 (!%p212_p10), %s1490_s18, 6 }
   0xf   : > { %215 = sbr.rel (%p212_p10) target bundleno = 333 (0x14d), region = 36  ;;  %s1109_s6 = scalar_lea.hbm (!%p212_p10), %s2019_s4, %s1338_s29 }
  0x10   : > { %s1112_s9 = sshll.u32 (!%p212_p10), %s1109_s6, 4  ;;  %s1113_s9 = int_to_ptr.hbm [resolvable:$true] %s1112_s9 }
  0x11   : > { %s1434_s10 = sshra.s32 (!%p212_p10), %s1113_s9, 4  ;;  %s1435_s10 = int_to_ptr.hbm [resolvable:$true] %s1434_s10 }
  0x12   : > { %p1441_p1 = scmp.lt.s32.totalorder (!%p212_p10), %s1435_s10, %s2019_s4 }
  0x14   : > { %v1330_v0 = vld [vmem:[%s2016_s1 + $0x8] sm:$0xff]  ;;  %v1331_v1 = vld [vmem:[%s2016_s1 + $0x10] sm:$0xff]  ;;  %s1590_s7 = scalar_select %p252_p11, %s1490_s18, 1  ;;  %v1332_v2 = vld [vmem:[%s2016_s1 + $0x18] sm:$0xff]  ;;  %vm295_vm0 = vsmask.f32 3328 }
  0x15   : > { %1358 = vmatpush.bf16.msra.mxu1 %v1330_v0  ;;  %1359 = vmatpush.bf16.msra.mxu2 %v1330_v0  ;;  %v1329_v3 = vld [vmem:[%s2016_s1] sm:$0xff]  ;;  %vm296_vm1 = vsmask.f32 7440  ;;  %vm430_vm2 = vcmask 130048   ;;  %vm547_vm4 = vcmask 1042432   ;;  %vm548_vm5 = vcmask 1046532  }
  0x16   : > { %1360 = vmatpush.bf16.msra.mxu3 %v1330_v0  ;;  %450 = vmatpush.bf16.msra.mxu0 %v1330_v0  ;;  %s1361_s8 = smul.u32 80, %s1590_s7  ;;  %v1333_v4 = vld [vmem:[%s2016_s1 + $0x20] sm:$0xff]  ;;  %vm1647_vm3 = vmor %vm295_vm0, %vm296_vm1  ;;  %s1328_s11 = sshll.u32 %s1590_s7, 5  ;;  %vm1087_vm8 = vcmask 195584  }
  0x17   : > { %vm1720_vm6 = vmor %vm547_vm4, %vm548_vm5  ;;  %s1912_s14 = scalar_lea.vmem %s2018_s3, %s1328_s11  ;;  %s249_s7 = sand.u32 1, %s1482_s16  }
  0x18   : > { %s1605_s24 = scalar_lea.vmem %s2015_s0, %s1361_s8  ;;  %s1097_s18 = scalar_lea.sflag [#allocation3], %s249_s7 }
  0x19   : > { %621 = vmatpush.bf16.msrb.mxu2 %v1331_v1  ;;  %517 = vmatpush.bf16.msrb.mxu1 %v1329_v3  ;;  %v1608_v5 = vld [vmem:[%s1605_s24 + $0x10] sm:$0xf]  ;;  %v1611_v6 = vld [vmem:[%s1605_s24 + $0x14] sm:$0x1]  ;;  %v1614_v7 = vld [vmem:[%s1605_s24 + $0x18] sm:$0xf] }
  0x1a   : > { %684 = vmatpush.bf16.msrb.mxu3 %v1332_v2  ;;  %760 = vmatpush.bf16.msrb.mxu0 %v1333_v4  ;;  %v1617_v8 = vld [vmem:[%s1605_s24 + $0x1c] sm:$0x1]  ;;  %v327_v9 = vshrl.u32 %v1608_v5, 16  ;;  %v330_v10 = vshll.u32 %v1608_v5, 16  ;;  %v336_v11 = vshll.u32 %v1611_v6, 16  ;;  %v341_v12 = vshrl.u32 %v1614_v7, 16 }
  0x1b   : > { %v344_v13 = vshll.u32 %v1614_v7, 16  ;;  %v350_v14 = vshll.u32 %v1617_v8, 16  ;;  %v1626_v15 = vld [vmem:[%s1605_s24 + $0x20] sm:$0xf]  ;;  %v1629_v16 = vld [vmem:[%s1605_s24 + $0x24] sm:$0x1] }
  0x1c   : > { %v329_v17 = vrot.slane %v327_v9, 4  ;;  %v332_v18 = vrot.slane %v330_v10, 5  ;;  %v338_v19 = vrot.slane %v336_v11, 5  ;;  %v343_v20 = vrot.slane %v341_v12, 4  ;;  %v1632_v21 = vld [vmem:[%s1605_s24 + $0x28] sm:$0xf] }
  0x1d   : > { %v346_v22 = vrot.slane %v344_v13, 5  ;;  %v352_v23 = vrot.slane %v350_v14, 5  ;;  %v1635_v24 = vld [vmem:[%s1605_s24 + $0x2c] sm:$0x1]  ;;  %v355_v25 = vshrl.u32 %v1626_v15, 16  ;;  %v358_v26 = vshll.u32 %v1626_v15, 16 }
  0x1e   : > { %v333_v27 = vor.u32 %v332_v18, %v329_v17  ;;  %v364_v28 = vshll.u32 %v1629_v16, 16  ;;  %v369_v29 = vshrl.u32 %v1632_v21, 16  ;;  %v372_v30 = vshll.u32 %v1632_v21, 16  ;;  %v1643_v31 = vld [vmem:[%s1605_s24 + $0x30] sm:$0xf]  ;;  %v1334_v11 = vld [vmem:[%s2016_s1 + $0x28] sm:$0xff] }
  0x1f   : > { %v347_v33 = vor.u32 %v346_v22, %v343_v20  ;;  %v357_v34 = vrot.slane %v355_v25, 4  ;;  %v360_v35 = vrot.slane %v358_v26, 5  ;;  %v378_v36 = vshll.u32 %v1635_v24, 16  ;;  %v1653_v37 = vld [vmem:[%s1605_s24 + $0x34] sm:$0x1]  ;;  %s1436_s11 = scalar_lea.hbm %s1435_s10, 64 }
  0x20   : > { %v334_v38 = vrot.slane %v333_v27, 4  ;;  %v366_v39 = vrot.slane %v364_v28, 5  ;;  %v371_v40 = vrot.slane %v369_v29, 4  ;;  %v374_v41 = vrot.slane %v372_v30, 5  ;;  %v1659_v48 = vld [vmem:[%s1605_s24 + $0x38] sm:$0xf]  ;;  %p1437_p12 = scmp.ne.s32.totalorder %s1435_s10, %s1436_s11 }
  0x21   : > { %v348_v42 = vrot.slane %v347_v33, 4  ;;  %v361_v43 = vor.u32 %v360_v35, %v357_v34  ;;  %v380_v44 = vrot.slane %v378_v36, 5  ;;  %v383_v45 = vshrl.u32 %v1643_v31, 16  ;;  %v1662_v49 = vld [vmem:[%s1605_s24 + $0x3c] sm:$0x1] }
  0x22   : > { %v339_v46 = vsel %vm1647_vm3, %v334_v38, %v338_v19  ;;  %v375_v47 = vor.u32 %v374_v41, %v371_v40  ;;  %v386_v50 = vshll.u32 %v1643_v31, 16  ;;  %v392_v51 = vshll.u32 %v1653_v37, 16  ;;  %v1673_v60 = vld [vmem:[%s1605_s24] sm:$0xf]  ;;  %v274_v1 = vld [vmem:[%s1605_s24 + $0x4] sm:$0x1]  ;;  %p1438_p13 = pnand %p1437_p12, %p1567_p4 }
  0x23   : > { %v353_v52 = vsel %vm1647_vm3, %v348_v42, %v352_v23  ;;  %v1668_v53 = vunpack.c.l.b16 %v339_v46  ;;  %v362_v54 = vrot.slane %v361_v43, 4  ;;  %v385_v55 = vrot.slane %v383_v45, 4  ;;  %v1690_v10 = vld [vmem:[%s1605_s24 + $0x8] sm:$0xf]  ;;  %v1335_v23 = vld [vmem:[%s2016_s1 + $0x30] sm:$0xff] }
  0x24   : > { %v1670_v56 = vunpack.c.l.b16 %v353_v52  ;;  %v376_v57 = vrot.slane %v375_v47, 4  ;;  %v388_v58 = vrot.slane %v386_v50, 5  ;;  %v394_v59 = vrot.slane %v392_v51, 5  ;;  %v276_v27 = vld [vmem:[%s1605_s24 + $0xc] sm:$0x1]  ;;  %p1439_p0 = pneg %p1438_p13 }
  0x25   : > { %v367_v61 = vsel %vm1647_vm3, %v362_v54, %v366_v39  ;;  %v397_v62 = vshrl.u32 %v1659_v48, 16  ;;  %v400_v63 = vshll.u32 %v1659_v48, 16  ;;  %v406_v0 = vshll.u32 %v1662_v49, 16 }
  0x26   : > { %v1683_v2 = vpack.c.b16 %v1670_v56, %v1668_v53  ;;  %v381_v3 = vsel %vm1647_vm3, %v376_v57, %v380_v44  ;;  %v1687_v4 = vunpack.c.l.b16 %v367_v61  ;;  %v389_v9 = vor.u32 %v388_v58, %v385_v55 }
  0x27   : > { %v1695_v12 = vunpack.c.l.b16 %v381_v3  ;;  %v399_v13 = vrot.slane %v397_v62, 4  ;;  %v402_v14 = vrot.slane %v400_v63, 5  ;;  %v408_v17 = vrot.slane %v406_v0, 5 }
  0x28   : > { %1246 = vmatmul.msk.bf16.vlgmr.msra.gmra.mxu1 %vm430_vm2, %v1683_v2  ;;  %v390_v18 = vrot.slane %v389_v9, 4  ;;  %v299_v19 = vshrl.u32 %v1673_v60, 16  ;;  %v302_v20 = vshll.u32 %v1673_v60, 16  ;;  %v308_v22 = vshll.u32 %v274_v1, 16 }
  0x29   : > { %v1706_v25 = vpack.c.b16 %v1695_v12, %v1687_v4  ;;  %v403_v26 = vor.u32 %v402_v14, %v399_v13  ;;  %v313_v28 = vshrl.u32 %v1690_v10, 16  ;;  %v316_v29 = vshll.u32 %v1690_v10, 16  ;;  %827 = vmatpush.bf16.msra.mxu1 %v1334_v11 }
  0x2a   : > { %v395_v30 = vsel %vm1647_vm3, %v390_v18, %v394_v59  ;;  %v301_v33 = vrot.slane %v299_v19, 4  ;;  %v304_v34 = vrot.slane %v302_v20, 5  ;;  %v310_v36 = vrot.slane %v308_v22, 5  ;;  %v1336_v59 = vld [vmem:[%s2016_s1 + $0x38] sm:$0xff] }
  0x2b   : > { %1247 = vmatmul.msk.bf16.vlgmr.msra.gmra.mxu2 %vm430_vm2, %v1706_v25  ;;  %v404_v35 = vrot.slane %v403_v26, 4  ;;  %v315_v38 = vrot.slane %v313_v28, 4  ;;  %v318_v39 = vrot.slane %v316_v29, 5  ;;  %v1715_v40 = vunpack.c.l.b16 %v395_v30 }
  0x2c   : > { %v305_v41 = vor.u32 %v304_v34, %v301_v33  ;;  %v322_v42 = vshll.u32 %v276_v27, 16  ;;  %v552_v43 = vrot.slane %v274_v1, 5  ;;  %878 = vmatpush.bf16.msra.mxu2 %v1335_v23  ;;  %v556_v46 = vrot.slane %v276_v27, 5 }
  0x2d   : > { %v409_v44 = vsel %vm1647_vm3, %v404_v35, %v408_v17  ;;  %v319_v45 = vor.u32 %v318_v39, %v315_v38  ;;  %v1257_v54 = vrot.slane %v1673_v60, 9  ;;  %v480_v57 = vunpack.c.l.b16 %v1673_v60 }
  0x2e   : > { %v1724_v50 = vunpack.c.l.b16 %v409_v44  ;;  %v306_v51 = vrot.slane %v305_v41, 4  ;;  %v324_v52 = vrot.slane %v322_v42, 5  ;;  %v1258_v58 = vrot.slane %v1690_v10, 9 }
  0x2f   : > { %v320_v55 = vrot.slane %v319_v45, 4  ;;  %v481_v63 = vunpack.c.l.b16 %v1690_v10  ;;  %v553_v0 = vsel %vm1720_vm6, %v1257_v54, %v552_v43  ;;  %v1337_v10 = vld [vmem:[%s2016_s1 + $0x40] sm:$0xff]  ;;  %v482_v19 = vunpack.c.l.b16 %v1608_v5 }
  0x30   : > { %v1734_v61 = vpack.c.b16 %v1724_v50, %v1715_v40  ;;  %v311_v62 = vsel %vm1647_vm3, %v306_v51, %v310_v36  ;;  %v1745_v3 = vsel %vm1720_vm6, %v1258_v58, %v556_v46  ;;  %v584_v11 = vunpack.c.l.b16 %v553_v0 }
  0x31   : > { %v325_v60 = vsel %vm1647_vm3, %v320_v55, %v324_v52  ;;  %v412_v1 = vunpack.c.l.b16 %v311_v62  ;;  %v585_v13 = vunpack.c.l.b16 %v1745_v3  ;;  %v488_v17 = vpack.c.b16 %v481_v63, %v480_v57  ;;  %v291_v3 = vld [vmem:[%s1605_s24 + $0x48] sm:$0xf] }
  0x32   : > { %1248 = vmatmul.msk.bf16.vlgmr.msra.gmra.mxu3 %vm430_vm2, %v1734_v61  ;;  %v413_v9 = vunpack.c.l.b16 %v325_v60  ;;  %v1259_v20 = vrot.slane %v1608_v5, 9  ;;  %v560_v22 = vrot.slane %v1611_v6, 5  ;;  %v1260_v23 = vrot.slane %v1614_v7, 9  ;;  %v290_v60 = vld [vmem:[%s1605_s24 + $0x44] sm:$0x1] }
  0x33   : > { %942 = vmatpush.bf16.msra.mxu3 %v1336_v59  ;;  %v592_v18 = vpack.c.b16 %v585_v13, %v584_v11  ;;  %v564_v26 = vrot.slane %v1617_v8, 5  ;;  %v655_v27 = vpack.c.b16 %v482_v19, %v481_v63  ;;  %v483_v28 = vunpack.c.l.b16 %v1614_v7 }
  0x34   : > { %v420_v14 = vpack.c.b16 %v413_v9, %v412_v1  ;;  %v1766_v29 = vsel %vm1720_vm6, %v1259_v20, %v560_v22  ;;  %v731_v5 = vpack.c.b16 %v1668_v53, %v413_v9  ;;  %v484_v34 = vunpack.c.l.b16 %v1626_v15 }
  0x35   : > { %v1770_v30 = vsel %vm1720_vm6, %v1260_v23, %v564_v26  ;;  %v586_v6 = vunpack.c.l.b16 %v1766_v29  ;;  %v489_v8 = vpack.c.b16 %v483_v28, %v482_v19  ;;  %v1261_v35 = vrot.slane %v1626_v15, 9  ;;  %v292_v29 = vld [vmem:[%s1605_s24 + $0x4c] sm:$0x1] }
  0x36   : > { %1245 = vmatmul.msk.bf16.vlgmr.msra.gmra.mxu0 %vm430_vm2, %v420_v14  ;;  %v587_v33 = vunpack.c.l.b16 %v1770_v30  ;;  %v568_v53 = vrot.slane %v1629_v16, 5  ;;  %v1262_v36 = vrot.slane %v1632_v21, 9  ;;  %v572_v38 = vrot.slane %v1635_v24, 5 }
  0x37   : > { %997 = vmatpush.bf16.msra.mxu0 %v1337_v10  ;;  %v656_v39 = vpack.c.b16 %v484_v34, %v483_v28  ;;  %v485_v41 = vunpack.c.l.b16 %v1632_v21  ;;  %v732_v15 = vpack.c.b16 %v1687_v4, %v1670_v56  ;;  %v1797_v21 = vld [vmem:[%s1605_s24 + $0x40] sm:$0xf]  ;;  %v486_v46 = vunpack.c.l.b16 %v1643_v31  ;;  %s1237_s24 = sshll.u32 %s249_s7, 6 }
  0x38   : > { %1253 = vmatmul.msk.bf16.vlgmr.msrb.gmra.mxu1 %vm430_vm2, %v488_v17  ;;  %v593_v7 = vpack.c.b16 %v587_v33, %v586_v6  ;;  %v569_v42 = vsel %vm1720_vm6, %v1261_v35, %v568_v53  ;;  %v573_v43 = vsel %vm1720_vm6, %v1262_v36, %v572_v38  ;;  %v715_v51 = vshrl.u32 %v1797_v21, 16  ;;  %s1926_s26 = scalar_lea.vmem [#allocation2], %s1237_s24 }
  0x39   : > { %v588_v44 = vunpack.c.l.b16 %v569_v42  ;;  %v589_v16 = vunpack.c.l.b16 %v573_v43  ;;  %v490_v45 = vpack.c.b16 %v485_v41, %v484_v34  ;;  %v718_v52 = vshll.u32 %v1797_v21, 16  ;;  %s1110_s8 = sshll.u32 %s1926_s26, 4  ;;  %s1111_s8 = int_to_ptr.vmem [resolvable:$true] %s1110_s8 }
  0x3a   : > { %v1263_v56 = vrot.slane %v1643_v31, 9  ;;  %v576_v4 = vrot.slane %v1653_v37, 5  ;;  %v1264_v54 = vrot.slane %v1659_v48, 9  ;;  %v580_v55 = vrot.slane %v1662_v49, 5 }
  0x3b   : > { %1269 = vmatmul.msk.bf16.vlgmr.msrb.gmra.mxu2 %vm430_vm2, %v592_v18  ;;  %v594_v24 = vpack.c.b16 %v589_v16, %v588_v44  ;;  %v657_v57 = vpack.c.b16 %v486_v46, %v485_v41  ;;  %v717_v58 = vrot.slane %v715_v51, 4  ;;  %v720_v59 = vrot.slane %v718_v52, 5 }
  0x3c   : > { %v487_v62 = vunpack.c.l.b16 %v1659_v48  ;;  %v577_v63 = vsel %vm1720_vm6, %v1263_v56, %v576_v4  ;;  %v581_v0 = vsel %vm1720_vm6, %v1264_v54, %v580_v55  ;;  %v733_v31 = vpack.c.b16 %v1715_v40, %v1695_v12 }
  0x3d   : > { %v590_v37 = vunpack.c.l.b16 %v577_v63  ;;  %v591_v1 = vunpack.c.l.b16 %v581_v0  ;;  %v721_v49 = vor.u32 %v720_v59, %v717_v58  ;;  %v724_v9 = vshll.u32 %v290_v60, 16 }
  0x3e   : > { %v491_v11 = vpack.c.b16 %v487_v62, %v486_v46  ;;  %v654_v17 = vunpack.c.l.b16 %v1797_v21  ;;  %v798_v20 = vpack.c.b16 %v586_v6, %v585_v13  ;;  %v799_v22 = vpack.c.b16 %v588_v44, %v587_v33 }
  0x3f   : > { %v595_v48 = vpack.c.b16 %v591_v1, %v590_v37  ;;  %v722_v10 = vrot.slane %v721_v49, 4  ;;  %v726_v14 = vrot.slane %v724_v9, 5  ;;  %v909_v13 = vshrl.u32 %v291_v3, 16 }
  0x40   : > { %v658_v12 = vpack.c.b16 %v654_v17, %v487_v62  ;;  %v912_v23 = vshll.u32 %v291_v3, 16  ;;  %v793_v26 = vrot.slane %v290_v60, 5  ;;  %v860_v33 = vunpack.c.l.b16 %v291_v3 }
  0x41   : > { %v727_v18 = vsel %vm1647_vm3, %v722_v10, %v726_v14  ;;  %v1314_v38 = vrot.slane %v291_v3, 9 }
  0x42   : > { %1277 = vmatmul.msk.bf16.vlgmr.msrb.gmra.mxu3 %vm430_vm2, %v655_v27  ;;  %v730_v40 = vunpack.c.l.b16 %v727_v18  ;;  %v911_v27 = vrot.slane %v909_v13, 4  ;;  %v914_v28 = vrot.slane %v912_v23, 5  ;;  %v861_v53 = vpack.c.b16 %v860_v33, %v654_v17 }
  0x44   : > { %v734_v19 = vpack.c.b16 %v730_v40, %v1724_v50  ;;  %v800_v50 = vpack.c.b16 %v590_v37, %v589_v16 }
  0x46   : > { %1285 = vmatmul.msk.bf16.vlgmr.msrb.gmra.mxu0 %vm430_vm2, %v731_v5  ;;  %v918_v5 = vshll.u32 %v292_v29, 16 }
  0x48   : > { %1254 = vmatmul.msk.bf16.gmra.mxu1 %vm430_vm2, %v489_v8 }
  0x4b   : > { %1270 = vmatmul.msk.bf16.gmra.mxu2 %vm430_vm2, %v593_v7 }
  0x52   : > { %1278 = vmatmul.msk.bf16.gmra.mxu3 %vm430_vm2, %v656_v39  ;;  %v975_v39 = vrot.slane %v292_v29, 5 }
  0x56   : > { %1286 = vmatmul.msk.bf16.gmra.mxu0 %vm430_vm2, %v732_v15 }
  0x58   : > { %1255 = vmatmul.msk.bf16.gmra.mxu1 %vm430_vm2, %v490_v45 }
  0x5b   : > { %1271 = vmatmul.msk.bf16.gmra.mxu2 %vm430_vm2, %v594_v24 }
  0x62   : > { %1279 = vmatmul.msk.bf16.gmra.mxu3 %vm430_vm2, %v657_v57 }
  0x66   : > { %1287 = vmatmul.msk.bf16.gmra.mxu0 %vm430_vm2, %v733_v31 }
  0x68   : > { %1256 = vmatmul.msk.bf16.gmra.mxu1 %vm430_vm2, %v491_v11 }
  0x6b   : > { %1272 = vmatmul.msk.bf16.gmra.mxu2 %vm430_vm2, %v595_v48 }
  0x72   : > { %1280 = vmatmul.msk.bf16.gmra.mxu3 %vm430_vm2, %v658_v12 }
  0x76   : > { %1288 = vmatmul.msk.bf16.gmra.mxu0 %vm430_vm2, %v734_v19 }
  0x78   : > { %1294 = vmatmul.msk.bf16.vlgmr.msra.gmra.mxu1 %vm430_vm2, %v798_v20 }
  0x7b   : > { %1302 = vmatmul.msk.bf16.vlgmr.msra.gmra.mxu2 %vm430_vm2, %v489_v8 }
  0x82   : > { %1310 = vmatmul.msk.bf16.vlgmr.msra.gmra.mxu3 %vm430_vm2, %v1683_v2  ;;  %v1289_v2 = vrot.slane %v1797_v21, 9 }
  0x84   : > { %v794_v30 = vsel %vm1720_vm6, %v1289_v2, %v793_v26 }
  0x85   : > { %v797_v6 = vunpack.c.l.b16 %v794_v30 }
  0x86   : > { %1319 = vmatmul.msk.bf16.vlgmr.msra.gmra.mxu0 %vm430_vm2, %v593_v7  ;;  %v920_v7 = vrot.slane %v918_v5, 5 }
  0x87   : > { %v801_v34 = vpack.c.b16 %v797_v6, %v591_v1 }
  0x88   : > { %1295 = vmatmul.msk.bf16.gmra.mxu1 %vm430_vm2, %v799_v22 }
  0x8b   : > { %1303 = vmatmul.msk.bf16.gmra.mxu2 %vm430_vm2, %v490_v45 }
  0x92   : > { %1311 = vmatmul.msk.bf16.gmra.mxu3 %vm430_vm2, %v1706_v25  ;;  %v915_v25 = vor.u32 %v914_v28, %v911_v27 }
  0x94   : > { %v916_v8 = vrot.slane %v915_v25, 4 }
  0x96   : > { %1320 = vmatmul.msk.bf16.gmra.mxu0 %vm430_vm2, %v594_v24  ;;  %v921_v36 = vsel %vm1647_vm3, %v916_v8, %v920_v7 }
  0x97   : > { %v924_v41 = vunpack.c.l.b16 %v921_v36 }
  0x98   : > { %1296 = vmatmul.msk.bf16.gmra.mxu1 %vm430_vm2, %v800_v50 }
  0x99   : > { %v925_v43 = vpack.c.b16 %v924_v41, %v730_v40 }
  0x9b   : > { %1304 = vmatmul.msk.bf16.gmra.mxu2 %vm430_vm2, %v491_v11 }
  0xa2   : > { %1312 = vmatmul.msk.bf16.gmra.mxu3 %vm430_vm2, %v1734_v61  ;;  %v976_v61 = vsel %vm1720_vm6, %v1314_v38, %v975_v39  ;;  %v1917_v39 = vld [vmem:[%s2017_s2] ss:$0 sm:$0xff] }
  0xa3   : > { %v979_v15 = vunpack.c.l.b16 %v976_v61 }
  0xa5   : > { %v1848_v35 = vpop.f32.mrf.mxu1  ;;  %v980_v32 = vpack.c.b16 %v979_v15, %v797_v6 }
  0xa6   : > { %1321 = vmatmul.msk.bf16.gmra.mxu0 %vm430_vm2, %v595_v48 }
  0xa8   : > { %1297 = vmatmul.msk.bf16.gmra.mxu1 %vm430_vm2, %v801_v34 }
  0xab   : > { %1305 = vmatmul.msk.bf16.gmra.mxu2 %vm430_vm2, %v861_v53 }
  0xad   : > { %v1857_v42 = vpop.f32.mrf.mxu1 }
  0xae   : > { %v1859_v44 = vpop.f32.mrf.mxu2 }
  0xb2   : > { %1313 = vmatmul.msk.bf16.gmra.mxu3 %vm430_vm2, %v925_v43  ;;  %v1340_v43 = vld [vmem:[%s1912_s14] sm:$0xff]  }
  0xb3   : > { %v452_v16 = vpop.f32.mrf.mxu0 }
  0xb5   : > { %v1862_v45 = vpop.f32.mrf.mxu3  ;;  %v519_v24 = vpop.f32.mrf.mxu1 }
  0xb6   : > { %1322 = vmatmul.msk.bf16.gmra.mxu0 %vm430_vm2, %v980_v32  ;;  %v1865_v21 = vpop.f32.mrf.mxu2  ;;  %v520_v20 = vadd.f32 %v519_v24, %v452_v16 }
  0xbb   : > { %v454_v46 = vpop.f32.mrf.mxu0 }
  0xbd   : > { %v1867_v47 = vpop.f32.mrf.mxu3  ;;  %v521_v51 = vpop.f32.mrf.mxu1 }
  0xbe   : > { %v623_v52 = vpop.f32.mrf.mxu2  ;;  %v522_v26 = vadd.f32 %v521_v51, %v454_v46  ;;  %v1341_v51 = vunpack.c.l.bf16 %v1340_v43 }
  0xbf   : > { %v643_v3 = vadd.f32 %v623_v52, %v520_v20 }
  0xc3   : > { %v762_v56 = vpop.f32.mrf.mxu0 }
  0xc5   : > { %v686_v4 = vpop.f32.mrf.mxu3  ;;  %v524_v54 = vpop.f32.mrf.mxu1 }
  0xc6   : > { %v625_v55 = vpop.f32.mrf.mxu2  ;;  %v706_v23 = vadd.f32 %v686_v4, %v643_v3  ;;  %v525_v7 = vadd.f32 %v524_v54, %v1848_v35 }
  0xc7   : > { %v644_v29 = vadd.f32 %v625_v55, %v522_v26 }
  0xc8   : > { %v782_v30 = vadd.f32 %v762_v56, %v706_v23  ;;  %v1342_v23 = vunpack.c.h.bf16 %v1340_v43 }
  0xcb   : > { %v764_v57 = vpop.f32.mrf.mxu0 }
  0xcd   : > { %v688_v58 = vpop.f32.mrf.mxu3  ;;  %v526_v59 = vpop.f32.mrf.mxu1 }
  0xce   : > { %v628_v62 = vpop.f32.mrf.mxu2  ;;  %v707_v6 = vadd.f32 %v688_v58, %v644_v29  ;;  %v527_v46 = vadd.f32 %v526_v59, %v1857_v42 }
  0xcf   : > { %v645_v36 = vadd.f32 %v628_v62, %v525_v7 }
  0xd0   : > { %v783_v41 = vadd.f32 %v764_v57, %v707_v6 }
  0xd3   : > { %v1869_v63 = vpop.f32.mrf.mxu0 }
  0xd5   : > { %v691_v0 = vpop.f32.mrf.mxu3  ;;  %v1871_v60 = vpop.f32.mrf.mxu1 }
  0xd6   : > { %v630_v31 = vpop.f32.mrf.mxu2  ;;  %v708_v32 = vadd.f32 %v691_v0, %v645_v36 }
  0xd7   : > { %v646_v4 = vadd.f32 %v630_v31, %v527_v46 }
  0xd8   : > { %v784_v62 = vadd.f32 %v1869_v63, %v708_v32  ;;  %v530_v63 = vadd.f32 %v1871_v60, %v1859_v44 }
  0xdb   : > { %v1873_v37 = vpop.f32.mrf.mxu0 }
  0xdd   : > { %v1875_v1 = vpop.f32.mrf.mxu3  ;;  %v1877_v49 = vpop.f32.mrf.mxu1 }
  0xde   : > { %v1879_v9 = vpop.f32.mrf.mxu2  ;;  %v709_v42 = vadd.f32 %v1875_v1, %v646_v4 }
  0xe0   : > { %v785_v6 = vadd.f32 %v1873_v37, %v709_v42 }
  0xe3   : > { %v1881_v11 = vpop.f32.mrf.mxu0 }
  0xe5   : > { %v1883_v48 = vpop.f32.mrf.mxu3  ;;  %v1885_v10 = vpop.f32.mrf.mxu1 }
  0xe6   : > { %v1887_v14 = vpop.f32.mrf.mxu2  ;;  %v535_v4 = vadd.f32 %v1885_v10, %v1862_v45 }
  0xeb   : > { %v1889_v17 = vpop.f32.mrf.mxu0 }
  0xed   : > { %v1891_v18 = vpop.f32.mrf.mxu3  ;;  %v1893_v12 = vpop.f32.mrf.mxu1 }
  0xee   : > { %v1895_v40 = vpop.f32.mrf.mxu2 }
  0xf3   : > { %v1897_v19 = vpop.f32.mrf.mxu0 }
  0xf5   : > { %v1899_v22 = vpop.f32.mrf.mxu3  ;;  %v829_v50 = vpop.f32.mrf.mxu1 }
  0xf6   : > { %v1901_v13 = vpop.f32.mrf.mxu2  ;;  %v849_v5 = vadd.f32 %v829_v50, %v782_v30  ;;  %v647_v30 = vadd.f32 %v1879_v9, %v530_v63 }
  0xf8   : > { %v710_v36 = vadd.f32 %v1883_v48, %v647_v30 }
  0xfa   : > { %v786_v32 = vadd.f32 %v1881_v11, %v710_v36 }
  0xfb   : > { %v1903_v2 = vpop.f32.mrf.mxu0 }
  0xfd   : > { %v1905_v27 = vpop.f32.mrf.mxu3  ;;  %v831_v28 = vpop.f32.mrf.mxu1 }
  0xfe   : > { %v880_v25 = vpop.f32.mrf.mxu2  ;;  %v850_v15 = vadd.f32 %v831_v28, %v783_v41  ;;  %v532_v41 = vadd.f32 %v1877_v49, %v1865_v21 }
  0xff   : > { %v900_v33 = vadd.f32 %v880_v25, %v849_v5 }
 0x103   : > { %v999_v8 = vpop.f32.mrf.mxu0 }
 0x105   : > { %v944_v34 = vpop.f32.mrf.mxu3  ;;  %v834_v53 = vpop.f32.mrf.mxu1 }
 0x106   : > { %v964_v38 = vadd.f32 %v944_v34, %v900_v33  ;;  %v882_v61 = vpop.f32.mrf.mxu2  ;;  %v851_v3 = vadd.f32 %v834_v53, %v784_v62  ;;  %v1355_v34 = vld [vmem:[%s1912_s14 + $0x8] sm:$0xff]  }
 0x107   : > { %v901_v24 = vadd.f32 %v882_v61, %v850_v15 }
 0x108   : > { %v1019_v35 = vadd.f32 %v999_v8, %v964_v38  ;;  %v1345_v38 = vunpack.c.l.bf16 %v1355_v34 }
 0x10a   : > { %v1031_v16 = vadd.f32 %v1917_v39, %v1019_v35  ;;  %v648_v35 = vadd.f32 %v1887_v14, %v532_v41 }
 0x10b   : > { %v1001_v52 = vpop.f32.mrf.mxu0 }
 0x10c   : > { %vm1039_vm7 = vcmp.ge.f32.partialorder %v1031_v16, 0.0  ;;  %v1047_v56 = vmul.f32 0.2, %v1031_v16 }
 0x10d   : > { %v946_v54 = vpop.f32.mrf.mxu3  ;;  %v836_v55 = vpop.f32.mrf.mxu1 }
 0x10e   : > { %v1055_v57 = vsel %vm1039_vm7, %v1031_v16, %v1047_v56  ;;  %v965_v58 = vadd.f32 %v946_v54, %v901_v24  ;;  %v885_v0 = vpop.f32.mrf.mxu2  ;;  %v852_v53 = vadd.f32 %v836_v55, %v785_v6  ;;  %v1346_v56 = vunpack.c.h.bf16 %v1355_v34 }
 0x10f   : > { %v1079_v20 = vadd.f32 %v1341_v51, %v1055_v57  ;;  %v902_v31 = vadd.f32 %v885_v0, %v851_v3  ;;  %v649_v55 = vadd.f32 %v1895_v40, %v535_v4 }
 0x110   : > { %v1020_v50 = vadd.f32 %v1001_v52, %v965_v58  ;;  %v711_v52 = vadd.f32 %v1891_v18, %v648_v35 }
 0x111   : > { %1088 = vst.msk [vmem:[%s1926_s26] sm:$0xff] %vm1087_vm8, %v1079_v20  ;;  %v712_v42 = vadd.f32 %v1899_v22, %v649_v55 }
 0x112   : > { %v1032_v59 = vadd.f32 %v1917_v39, %v1020_v50  ;;  %v787_v62 = vadd.f32 %v1889_v17, %v711_v52  ;;  %v1356_v50 = vld [vmem:[%s1912_s14 + $0x10] sm:$0xff]  }
 0x113   : > { %v1004_v26 = vpop.f32.mrf.mxu0  ;;  %v788_v30 = vadd.f32 %v1897_v19, %v712_v42 }
 0x114   : > { %vm1040_vm9 = vcmp.ge.f32.partialorder %v1032_v59, 0.0  ;;  %v1048_v28 = vmul.f32 0.2, %v1032_v59 }
 0x115   : > { %v949_v29 = vpop.f32.mrf.mxu3  ;;  %v839_v33 = vpop.f32.mrf.mxu1 }
 0x116   : > { %v1056_v25 = vsel %vm1040_vm9, %v1032_v59, %v1048_v28  ;;  %v966_v5 = vadd.f32 %v949_v29, %v902_v31  ;;  %v887_v1 = vpop.f32.mrf.mxu2  ;;  %v853_v46 = vadd.f32 %v839_v33, %v786_v32  ;;  %v1349_v31 = vunpack.c.l.bf16 %v1356_v50 }
 0x117   : > { %v1080_v8 = vadd.f32 %v1342_v23, %v1056_v25  ;;  %v903_v60 = vadd.f32 %v887_v1, %v852_v53  ;;  %v537_v23 = vadd.f32 %v1893_v12, %v1867_v47  ;;  %v1350_v33 = vunpack.c.h.bf16 %v1356_v50 }
 0x118   : > { %v1021_v7 = vadd.f32 %v1004_v26, %v966_v5 }
 0x119   : > { %1089 = vst.msk [vmem:[%s1926_s26 + $0x8] sm:$0xff] %vm1087_vm8, %v1080_v8  ;;  %v650_v63 = vadd.f32 %v1901_v13, %v537_v23 }
 0x11a   : > { %v1033_v44 = vadd.f32 %v1917_v39, %v1021_v7 }
 0x11b   : > { %v1006_v9 = vpop.f32.mrf.mxu0  ;;  %v713_v1 = vadd.f32 %v1905_v27, %v650_v63  ;;  %v1357_v27 = vld [vmem:[%s1912_s14 + $0x18] sm:$0xff]   ;;  %s1440_s14 = scalar_lea.hbm %s2019_s4, 128 }
 0x11c   : > { %vm1041_vm10 = vcmp.ge.f32.partialorder %v1033_v44, 0.0  ;;  %v1049_v37 = vmul.f32 0.2, %v1033_v44  ;;  %p1442_p2 = scmp.lt.s32.totalorder %s1440_s14, %s1436_s11 }
 0x11d   : > { %v951_v61 = vpop.f32.mrf.mxu3  ;;  %v841_v51 = vpop.f32.mrf.mxu1  ;;  %v789_v36 = vadd.f32 %v1903_v2, %v713_v1 }
 0x11e   : > { %v1057_v43 = vsel %vm1041_vm10, %v1033_v44, %v1049_v37  ;;  %v967_v15 = vadd.f32 %v951_v61, %v903_v60  ;;  %v890_v16 = vpop.f32.mrf.mxu2  ;;  %v854_v3 = vadd.f32 %v841_v51, %v787_v62  ;;  %v1353_v61 = vunpack.c.l.bf16 %v1357_v27  ;;  %p1443_p3 = por %p1442_p2, %p1441_p1 }
 0x11f   : > { %v1081_v48 = vadd.f32 %v1345_v38, %v1057_v43  ;;  %v904_v49 = vadd.f32 %v890_v16, %v853_v46  ;;  %v1354_v46 = vunpack.c.h.bf16 %v1357_v27 }
 0x120   : > { %v1022_v24 = vadd.f32 %v1006_v9, %v967_v15  ;;  %p1444_p5 = pnand %p1443_p3, %p1439_p0 }
 0x121   : > { %1090 = vst.msk [vmem:[%s1926_s26 + $0x10] sm:$0xff] %vm1087_vm8, %v1081_v48 }
 0x122   : > { %v1034_v21 = vadd.f32 %v1917_v39, %v1022_v24 }
 0x123   : > { %v1009_v14 = vpop.f32.mrf.mxu0 }
 0x124   : > { %vm1042_vm11 = vcmp.ge.f32.partialorder %v1034_v21, 0.0  ;;  %v1050_v11 = vmul.f32 0.2, %v1034_v21 }
 0x125   : > { %v954_v54 = vpop.f32.mrf.mxu3  ;;  %v844_v59 = vpop.f32.mrf.mxu1 }
 0x126   : > { %v1058_v57 = vsel %vm1042_vm11, %v1034_v21, %v1050_v11  ;;  %v968_v58 = vadd.f32 %v954_v54, %v904_v49  ;;  %v892_v18 = vpop.f32.mrf.mxu2  ;;  %v855_v6 = vadd.f32 %v844_v59, %v788_v30 }
 0x127   : > { %v1082_v0 = vadd.f32 %v1346_v56, %v1058_v57  ;;  %v905_v10 = vadd.f32 %v892_v18, %v854_v3 }
 0x128   : > { %v1023_v20 = vadd.f32 %v1009_v14, %v968_v58 }
 0x129   : > { %1091 = vst.msk [vmem:[%s1926_s26 + $0x18] sm:$0xff] %vm1087_vm8, %v1082_v0 }
 0x12a   : > { %v1035_v45 = vadd.f32 %v1917_v39, %v1023_v20 }
 0x12b   : > { %v1011_v40 = vpop.f32.mrf.mxu0 }
 0x12c   : > { %vm1043_vm12 = vcmp.ge.f32.partialorder %v1035_v45, 0.0  ;;  %v1051_v17 = vmul.f32 0.2, %v1035_v45 }
 0x12d   : > { %v956_v26 = vpop.f32.mrf.mxu3  ;;  %v846_v8 = vpop.f32.mrf.mxu1 }
 0x12e   : > { %v1059_v28 = vsel %vm1043_vm12, %v1035_v45, %v1051_v17  ;;  %v969_v29 = vadd.f32 %v956_v26, %v905_v10  ;;  %v895_v22 = vpop.f32.mrf.mxu2  ;;  %v856_v9 = vadd.f32 %v846_v8, %v789_v36 }
 0x12f   : > { %v1083_v25 = vadd.f32 %v1349_v31, %v1059_v28  ;;  %v906_v12 = vadd.f32 %v895_v22, %v855_v6 }
 0x130   : > { %v1024_v5 = vadd.f32 %v1011_v40, %v969_v29 }
 0x131   : > { %1092 = vst.msk [vmem:[%s1926_s26 + $0x20] sm:$0xff] %vm1087_vm8, %v1083_v25 }
 0x132   : > { %v1036_v47 = vadd.f32 %v1917_v39, %v1024_v5 }
 0x133   : > { %v1014_v7 = vpop.f32.mrf.mxu0 }
 0x134   : > { %vm1044_vm13 = vcmp.ge.f32.partialorder %v1036_v47, 0.0  ;;  %v1052_v13 = vmul.f32 0.2, %v1036_v47 }
 0x135   : > { %v959_v34 = vpop.f32.mrf.mxu3 }
 0x136   : > { %v1060_v19 = vsel %vm1044_vm13, %v1036_v47, %v1052_v13  ;;  %v970_v53 = vadd.f32 %v959_v34, %v906_v12  ;;  %v897_v60 = vpop.f32.mrf.mxu2 }
 0x137   : > { %v1084_v44 = vadd.f32 %v1350_v33, %v1060_v19  ;;  %v907_v37 = vadd.f32 %v897_v60, %v856_v9 }
 0x138   : > { %v1025_v38 = vadd.f32 %v1014_v7, %v970_v53 }
 0x139   : > { %1093 = vst.msk [vmem:[%s1926_s26 + $0x28] sm:$0xff] %vm1087_vm8, %v1084_v44 }
 0x13a   : > { %v1037_v41 = vadd.f32 %v1917_v39, %v1025_v38 }
 0x13b   : > { %v1016_v16 = vpop.f32.mrf.mxu0 }
 0x13c   : > { %vm1045_vm14 = vcmp.ge.f32.partialorder %v1037_v41, 0.0  ;;  %v1053_v35 = vmul.f32 0.2, %v1037_v41 }
 0x13d   : > { %v961_v43 = vpop.f32.mrf.mxu3 }
 0x13e   : > { %v1061_v15 = vsel %vm1045_vm14, %v1037_v41, %v1053_v35  ;;  %v971_v32 = vadd.f32 %v961_v43, %v907_v37 }
 0x13f   : > { %v1085_v2 = vadd.f32 %v1353_v61, %v1061_v15 }
 0x140   : > { %v1026_v48 = vadd.f32 %v1016_v16, %v971_v32 }
 0x141   : > { %1094 = vst.msk [vmem:[%s1926_s26 + $0x30] sm:$0xff] %vm1087_vm8, %v1085_v2 }
 0x142   : > { %v1038_v24 = vadd.f32 %v1917_v39, %v1026_v48 }
 0x144   : > { %vm1046_vm15 = vcmp.ge.f32.partialorder %v1038_v24, 0.0  ;;  %v1054_v51 = vmul.f32 0.2, %v1038_v24 }
 0x146   : > { %v1062_v52 = vsel %vm1046_vm15, %v1038_v24, %v1054_v51 }
 0x147   : > { %v1086_v21 = vadd.f32 %v1354_v46, %v1062_v52 }
 0x149   : > { %1095 = vst.msk [vmem:[%s1926_s26 + $0x38] sm:$0xff] %vm1087_vm8, %v1086_v21 }
 0x14a   : > { %1447 = shalt.err (!%p1444_p5)
}
 0x14b   : > { %s1500_s7 = smov 128   ;;  %s1501_s24 = smov 8  }
 0x14c   : > { %1362 = dma.vmem_to_hbm [thread:$0]  (%p1567_p4), %s1111_s8, 1024, %s1113_s9, %s1097_s18, %s1500_s7, %s1500_s7, %s1501_s24  }
 0x14d PF: > { %p1368_p6 = scmp.ge.s32.totalorder %s1498_s20, 2  ;;  %s1127_s26 = sand.u32 1, %s1478_s15  }
 0x14e   : > { %s1128_s29 = scalar_lea.sflag [#allocation3], %s1127_s26 }
 0x14f   : > { %p1365_p7 = pnand %p1368_p6, %p1574_p8 }
 0x151   : > { %p1366_p9 = pneg %p1365_p7 }
 0x153   : > { %1473 = dma.done.wait (%p1366_p9), %s1128_s29, 1024  }
 0x154   : > { %1475 = vsyncadd (%p1366_p9), %s1128_s29, 4294966272  ;;  %s17_s20 = sadd.s32 1, %s1498_s20   ;;  %s2026_s15 = smov %s1482_s16 }
 0x155   : > { %p14_p10 = scmp.ge.s32.totalorder %s17_s20, 4   ;;  %s2027_s16 = smov %s1486_s17 }
 0x156   : > { %s2028_s17 = smov %s1580_s28  ;;  %s2029_s18 = smov %s1494_s19 }
 0x157   : > { %s2030_s19 = smov %s2032_s23  ;;  %16 = sbr.rel (!%p14_p10) target bundleno = 4 (0x4), region = 80 }
 0x15c   :  { %1134 = vsyncpa [#allocation3], 1 }
 0x15d   :  { %1136 = vsyncpa [#allocation3 + $0x1], 1 }

</bundles_post_ra>
